<compile_context>
chip_gen: v6e
topology: v6e:2x2x1
jax: 0.10.0
libtpu: 0.0.40
codegen_flags: <defaults>
</compile_context>

<pallas_src>
import functools
import math

import jax
import jax.numpy as jnp
from jax import lax
from jax.experimental import pallas as pl
from jax.experimental.pallas import tpu as pltpu


def _round_up(x, m):
    return ((x + m - 1) // m) * m


def _box_offset_intersection_kernel(
    emb_ref, w1_ref, b1_ref, w2_ref, b2_ref, out_ref,
    sum_acc, min_acc, *, n_total, n_chunk, mask_n, matmul_dtype,
):
    k = pl.program_id(1)  # N-chunk (reduction) axis, innermost

    @pl.when(k == 0)
    def _init():
        sum_acc[...] = jnp.zeros_like(sum_acc)
        min_acc[...] = jnp.full_like(min_acc, jnp.inf)

    x = emb_ref[...]                                   # (NC, TB, Dp) float32
    nc, tb, dp = x.shape

    # Layer 1 as ONE big 2D matmul: (NC*TB, Dp) @ (Dp, Dp) -> full MXU row usage.
    flat = x.reshape(nc * tb, dp)
    w1 = w1_ref[...]
    if matmul_dtype is not None:                       # optional bf16 MXU path
        flat = flat.astype(matmul_dtype)
        w1 = w1.astype(matmul_dtype)
    h = jnp.dot(flat, w1, preferred_element_type=jnp.float32) + b1_ref[...]
    h = jnp.maximum(h, 0.0).reshape(nc, tb, dp)

    if mask_n:
        # Last N-chunk may contain zero-padded rows: drop them from sum and min.
        row = k * n_chunk + lax.broadcasted_iota(jnp.int32, (nc, 1, 1), 0)
        valid = row < n_total                          # (NC, 1, 1)
        h = jnp.where(valid, h, 0.0)
        x = jnp.where(valid, x, jnp.inf)

    # Single pass over the tile: accumulate the relu-sum and the running min.
    sum_acc[...] += jnp.sum(h, axis=0)
    min_acc[...] = jnp.minimum(min_acc[...], jnp.min(x, axis=0))

    @pl.when(k == pl.num_programs(1) - 1)
    def _finalize():
        mean = sum_acc[...] * (1.0 / n_total)          # fold 1/N into epilogue
        w2 = w2_ref[...]
        m_in = mean
        if matmul_dtype is not None:
            m_in = mean.astype(matmul_dtype)
            w2 = w2.astype(matmul_dtype)
        z = jnp.dot(m_in, w2, preferred_element_type=jnp.float32) + b2_ref[...]
        gate = jax.nn.sigmoid(z)
        out_ref[...] = min_acc[...] * gate


def _choose_tb(B, NC, Dp, budget_bytes=24 * 1024 * 1024):
    """Largest batch tile (multiple of 8) whose VMEM working set fits the budget
    (~24 MiB keeps headroom even on v7x's 64 MiB VMEM / 32 MiB scoped default)."""
    def working_set(tb):
        emb = 2 * NC * tb * Dp * 4          # double-buffered embeddings tile
        wts = 2 * Dp * Dp * 4 + 2 * Dp * 4  # resident W1/W2 + biases
        acc = 2 * tb * Dp * 4               # sum + min scratch accumulators
        out = 2 * tb * Dp * 4               # double-buffered output tile
        return emb + wts + acc + out

    tb = 512
    while tb > 8 and working_set(tb) > budget_bytes:
        tb //= 2
    return min(tb, _round_up(B, 8))


def _box_offset_intersection_impl(embeddings, w1, b1, w2, b2, *, matmul_dtype=None):
    """embeddings: (N, B, D); w1/w2: (D, D) PyTorch layout (out, in); b1/b2: (D,)."""
    N, B, D = embeddings.shape

    Dp = _round_up(D, 128)          # lane-dense last dim
    NC = min(N, 8)                  # N-chunk size (reduction tile)
    TB = _choose_tb(B, NC, Dp)      # batch tile, multiple of 8 sublanes
    Np = _round_up(N, NC)
    Bp = _round_up(B, TB)

    emb_p = embeddings
    if (Np, Bp, Dp) != (N, B, D):
        emb_p = jnp.pad(embeddings, ((0, Np - N), (0, Bp - B), (0, Dp - D)))

    # Pre-transpose (kernel computes x @ W) and zero-pad weights/biases once.
    # For repeated inference, store them in this layout to skip this step entirely.
    w1_t = jnp.pad(w1.T, ((0, Dp - D), (0, Dp - D)))
    w2_t = jnp.pad(w2.T, ((0, Dp - D), (0, Dp - D)))
    b1_p = jnp.pad(b1, (0, Dp - D)).reshape(1, Dp)
    b2_p = jnp.pad(b2, (0, Dp - D)).reshape(1, Dp)

    grid = (Bp // TB, Np // NC)
    mask_n = Np != N

    # VMEM working-set estimate (bytes) -> explicit limit with headroom.
    ws = (2 * NC * TB * Dp + 2 * Dp * Dp + 2 * Dp + 4 * TB * Dp) * 4
    vmem_limit = int(min(max(2 * ws, 16 * 1024 * 1024), 48 * 1024 * 1024))

    kernel = functools.partial(
        _box_offset_intersection_kernel,
        n_total=N, n_chunk=NC, mask_n=mask_n, matmul_dtype=matmul_dtype,
    )

    out_p = pl.pallas_call(
        kernel,
        out_shape=jax.ShapeDtypeStruct((Bp, Dp), jnp.float32),
        grid_spec=pltpu.PrefetchScalarGridSpec(
            num_scalar_prefetch=0,
            grid=grid,
            in_specs=[
                pl.BlockSpec((NC, TB, Dp), lambda b, k: (k, b, 0)),   # embeddings tile
                pl.BlockSpec((Dp, Dp), lambda b, k: (0, 0)),          # W1 (resident)
                pl.BlockSpec((1, Dp), lambda b, k: (0, 0)),           # b1 (resident)
                pl.BlockSpec((Dp, Dp), lambda b, k: (0, 0)),          # W2 (resident)
                pl.BlockSpec((1, Dp), lambda b, k: (0, 0)),           # b2 (resident)
            ],
            out_specs=pl.BlockSpec((TB, Dp), lambda b, k: (b, 0)),
            scratch_shapes=[
                pltpu.VMEM((TB, Dp), jnp.float32),   # running sum of relu(x@W1+b1)
                pltpu.VMEM((TB, Dp), jnp.float32),   # running min of x
            ],
        ),
        compiler_params=pltpu.CompilerParams(
            dimension_semantics=("parallel", "arbitrary"),
            vmem_limit_bytes=vmem_limit,
        ),
    )(emb_p, w1_t, b1_p, w2_t, b2_p)

    return out_p[:B, :D]


# Keep the matmul in f32 by default so the 1e-5 self-check holds; pass
# matmul_dtype=jnp.bfloat16 on v6e/v7x for ~2-4x MXU throughput (f32 accumulation).
box_offset_intersection = jax.jit(
    _box_offset_intersection_impl, static_argnames=("matmul_dtype",)
)


def _reference(embeddings, w1, b1, w2, b2):
    h = jax.nn.relu(embeddings @ w1.T + b1)
    mean = jnp.mean(h, axis=0)
    gate = jax.nn.sigmoid(mean @ w2.T + b2)
    offset = jnp.min(embeddings, axis=0)
    return offset * gate


def _xavier_uniform(key, shape):
    # matches nn.init.xavier_uniform_ for a (out, in) Linear weight
    fan_out, fan_in = shape
    limit = (6.0 / (fan_in + fan_out)) ** 0.5
    return jax.random.uniform(key, shape, jnp.float32, -limit, limit)


if __name__ == "__main__":
    key = jax.random.PRNGKey(0)

    # Second case exercises D/B padding and the ragged-N reduction mask.
    for (N, B, D) in [(8, 2, 32), (10, 3, 40)]:
        key, k_emb, k_w1, k_b1, k_w2, k_b2 = jax.random.split(key, 6)

        embeddings = jax.random.normal(k_emb, (N, B, D), jnp.float32)
        w1 = _xavier_uniform(k_w1, (D, D))
        w2 = _xavier_uniform(k_w2, (D, D))
        bound = 1.0 / math.sqrt(D)
        b1 = jax.random.uniform(k_b1, (D,), jnp.float32, -bound, bound)
        b2 = jax.random.uniform(k_b2, (D,), jnp.float32, -bound, bound)

        out = jax.block_until_ready(
            box_offset_intersection(embeddings, w1, b1, w2, b2)
        )
        ref = _reference(embeddings, w1, b1, w2, b2)
        assert out.shape == (B, D)
        assert jnp.allclose(out, ref, atol=1e-5, rtol=1e-5), (
            f"mismatch vs reference for N={N}, B={B}, D={D}"
        )

    print("KERNEL_OK")
</pallas_src>

<mosaic_0001>
module attributes {stable_mosaic.version = 11 : i64} {
  func.func @_box_offset_intersection_kernel(%arg0: i32, %arg1: i32, %arg2: memref<8x8x128xf32, #tpu.memory_space<vmem>>, %arg3: memref<128x128xf32, #tpu.memory_space<vmem>>, %arg4: memref<1x128xf32, #tpu.memory_space<vmem>>, %arg5: memref<128x128xf32, #tpu.memory_space<vmem>>, %arg6: memref<1x128xf32, #tpu.memory_space<vmem>>, %arg7: memref<8x128xf32, #tpu.memory_space<vmem>>, %arg8: memref<8x128xf32, #tpu.memory_space<vmem>>, %arg9: memref<8x128xf32, #tpu.memory_space<vmem>>) attributes {dimension_semantics = [#tpu.dimension_semantics<parallel>, #tpu.dimension_semantics<arbitrary>], iteration_bounds = array<i64: 1, 1>, scalar_prefetch = 0 : i64, scratch_operands = 2 : i64, tpu.core_type = #tpu.core_type<tc>, window_params = [{transform_indices = @transform_0, window_bounds = array<i64: 8, 8, 128>}, {pipeline_mode = #tpu.pipeline_mode<synchronous>, transform_indices = @transform_1, window_bounds = array<i64: 128, 128>}, {pipeline_mode = #tpu.pipeline_mode<synchronous>, transform_indices = @transform_2, window_bounds = array<i64: 1, 128>}, {pipeline_mode = #tpu.pipeline_mode<synchronous>, transform_indices = @transform_3, window_bounds = array<i64: 128, 128>}, {pipeline_mode = #tpu.pipeline_mode<synchronous>, transform_indices = @transform_4, window_bounds = array<i64: 1, 128>}, {transform_indices = @transform_5, window_bounds = array<i64: 8, 128>}]} {
    %c0_i32 = arith.constant 0 : i32
    %0 = arith.cmpi eq, %arg1, %c0_i32 : i32
    %1 = arith.extui %0 : i1 to i32
    %c0_i32_0 = arith.constant 0 : i32
    %2 = arith.cmpi ne, %1, %c0_i32_0 : i32
    scf.if %2 {
      %cst_20 = arith.constant 0.000000e+00 : f32
      %24 = vector.broadcast %cst_20 : f32 to vector<8x128xf32>
      %c0_21 = arith.constant 0 : index
      %c0_22 = arith.constant 0 : index
      %25 = vector.load %arg8[%c0_21, %c0_22] : memref<8x128xf32, #tpu.memory_space<vmem>>, vector<8x128xf32>
      tpu.vector_store %arg8[%c0_21, %c0_22], %24 {strides = array<i32>} : memref<8x128xf32, #tpu.memory_space<vmem>>, vector<8x128xf32>,
      %cst_23 = arith.constant 0x7F800000 : f32
      %26 = vector.broadcast %cst_23 : f32 to vector<8x128xf32>
      %c0_24 = arith.constant 0 : index
      %c0_25 = arith.constant 0 : index
      %27 = vector.load %arg9[%c0_24, %c0_25] : memref<8x128xf32, #tpu.memory_space<vmem>>, vector<8x128xf32>
      tpu.vector_store %arg9[%c0_24, %c0_25], %26 {strides = array<i32>} : memref<8x128xf32, #tpu.memory_space<vmem>>, vector<8x128xf32>,
    } else {
    }
    %c0 = arith.constant 0 : index
    %c0_1 = arith.constant 0 : index
    %c0_2 = arith.constant 0 : index
    %3 = vector.load %arg2[%c0, %c0_1, %c0_2] : memref<8x8x128xf32, #tpu.memory_space<vmem>>, vector<8x8x128xf32>
    %4 = vector.shape_cast %3 : vector<8x8x128xf32> to vector<64x128xf32>
    %c0_3 = arith.constant 0 : index
    %c0_4 = arith.constant 0 : index
    %5 = vector.load %arg3[%c0_3, %c0_4] : memref<128x128xf32, #tpu.memory_space<vmem>>, vector<128x128xf32>
    %cst = arith.constant dense<0.000000e+00> : vector<64x128xf32>
    %6 = tpu.matmul %4, %5, %cst {dimension_numbers = #tpu.dot_dimension_numbers<[1], [0], [0], [1], [0, 0, 1, 1], [], []>} : vector<64x128xf32>, vector<128x128xf32>, vector<64x128xf32> -> vector<64x128xf32>
    %c0_5 = arith.constant 0 : index
    %c0_6 = arith.constant 0 : index
    %7 = vector.load %arg4[%c0_5, %c0_6] : memref<1x128xf32, #tpu.memory_space<vmem>>, vector<1x128xf32>
    %8 = vector.broadcast %7 : vector<1x128xf32> to vector<64x128xf32>
    %9 = arith.addf %6, %8 : vector<64x128xf32>
    %cst_7 = arith.constant 0.000000e+00 : f32
    %10 = vector.broadcast %cst_7 : f32 to vector<64x128xf32>
    %11 = arith.maximumf %9, %10 : vector<64x128xf32>
    %12 = vector.shape_cast %11 : vector<64x128xf32> to vector<8x8x128xf32>
    %c0_8 = arith.constant 0 : index
    %c0_9 = arith.constant 0 : index
    %13 = vector.load %arg8[%c0_8, %c0_9] : memref<8x128xf32, #tpu.memory_space<vmem>>, vector<8x128xf32>
    %cst_10 = arith.constant dense<0.000000e+00> : vector<8x128xf32>
    %14 = vector.multi_reduction <add>, %12, %cst_10 [0] : vector<8x8x128xf32> to vector<8x128xf32>
    %15 = arith.addf %13, %14 : vector<8x128xf32>
    %c0_11 = arith.constant 0 : index
    %c0_12 = arith.constant 0 : index
    %16 = vector.load %arg8[%c0_11, %c0_12] : memref<8x128xf32, #tpu.memory_space<vmem>>, vector<8x128xf32>
    tpu.vector_store %arg8[%c0_11, %c0_12], %15 {strides = array<i32>} : memref<8x128xf32, #tpu.memory_space<vmem>>, vector<8x128xf32>,
    %c0_13 = arith.constant 0 : index
    %c0_14 = arith.constant 0 : index
    %17 = vector.load %arg9[%c0_13, %c0_14] : memref<8x128xf32, #tpu.memory_space<vmem>>, vector<8x128xf32>
    %cst_15 = arith.constant dense<0x7F800000> : vector<8x128xf32>
    %18 = vector.multi_reduction <minimumf>, %3, %cst_15 [0] : vector<8x8x128xf32> to vector<8x128xf32>
    %19 = arith.minimumf %17, %18 : vector<8x128xf32>
    %c0_16 = arith.constant 0 : index
    %c0_17 = arith.constant 0 : index
    %20 = vector.load %arg9[%c0_16, %c0_17] : memref<8x128xf32, #tpu.memory_space<vmem>>, vector<8x128xf32>
    tpu.vector_store %arg9[%c0_16, %c0_17], %19 {strides = array<i32>} : memref<8x128xf32, #tpu.memory_space<vmem>>, vector<8x128xf32>,
    %c0_i32_18 = arith.constant 0 : i32
    %21 = arith.cmpi eq, %arg1, %c0_i32_18 : i32
    %22 = arith.extui %21 : i1 to i32
    %c0_i32_19 = arith.constant 0 : i32
    %23 = arith.cmpi ne, %22, %c0_i32_19 : i32
    scf.if %23 {
      %c0_20 = arith.constant 0 : index
      %c0_21 = arith.constant 0 : index
      %24 = vector.load %arg8[%c0_20, %c0_21] : memref<8x128xf32, #tpu.memory_space<vmem>>, vector<8x128xf32>
      %cst_22 = arith.constant 1.250000e-01 : f32
      %25 = vector.broadcast %cst_22 : f32 to vector<8x128xf32>
      %26 = arith.mulf %24, %25 : vector<8x128xf32>
      %c0_23 = arith.constant 0 : index
      %c0_24 = arith.constant 0 : index
      %27 = vector.load %arg5[%c0_23, %c0_24] : memref<128x128xf32, #tpu.memory_space<vmem>>, vector<128x128xf32>
      %cst_25 = arith.constant dense<0.000000e+00> : vector<8x128xf32>
      %28 = tpu.matmul %26, %27, %cst_25 {dimension_numbers = #tpu.dot_dimension_numbers<[1], [0], [0], [1], [0, 0, 1, 1], [], []>} : vector<8x128xf32>, vector<128x128xf32>, vector<8x128xf32> -> vector<8x128xf32>
      %c0_26 = arith.constant 0 : index
      %c0_27 = arith.constant 0 : index
      %29 = vector.load %arg6[%c0_26, %c0_27] : memref<1x128xf32, #tpu.memory_space<vmem>>, vector<1x128xf32>
      %30 = vector.broadcast %29 : vector<1x128xf32> to vector<8x128xf32>
      %31 = arith.addf %28, %30 : vector<8x128xf32>
      %32 = arith.negf %31 : vector<8x128xf32>
      %33 = math.exp %32 : vector<8x128xf32>
      %cst_28 = arith.constant 1.000000e+00 : f32
      %34 = vector.broadcast %cst_28 : f32 to vector<8x128xf32>
      %35 = arith.addf %34, %33 : vector<8x128xf32>
      %36 = arith.divf %34, %35 : vector<8x128xf32>
      %c0_29 = arith.constant 0 : index
      %c0_30 = arith.constant 0 : index
      %37 = vector.load %arg9[%c0_29, %c0_30] : memref<8x128xf32, #tpu.memory_space<vmem>>, vector<8x128xf32>
      %38 = arith.mulf %37, %36 : vector<8x128xf32>
      %c0_31 = arith.constant 0 : index
      %c0_32 = arith.constant 0 : index
      %39 = vector.load %arg7[%c0_31, %c0_32] : memref<8x128xf32, #tpu.memory_space<vmem>>, vector<8x128xf32>
      tpu.vector_store %arg7[%c0_31, %c0_32], %38 {strides = array<i32>} : memref<8x128xf32, #tpu.memory_space<vmem>>, vector<8x128xf32>,
    } else {
    }
    return
  }
  func.func @transform_0(%arg0: i32, %arg1: i32) -> (i32, i32, i32) {
    %c0_i32 = arith.constant 0 : i32
    %c0_i32_0 = arith.constant 0 : i32
    return %arg1, %arg0, %c0_i32 : i32, i32, i32
  }
  func.func @transform_1(%arg0: i32, %arg1: i32) -> (i32, i32) {
    %c0_i32 = arith.constant 0 : i32
    %c0_i32_0 = arith.constant 0 : i32
    %c0_i32_1 = arith.constant 0 : i32
    return %c0_i32, %c0_i32_0 : i32, i32
  }
  func.func @transform_2(%arg0: i32, %arg1: i32) -> (i32, i32) {
    %c0_i32 = arith.constant 0 : i32
    %c0_i32_0 = arith.constant 0 : i32
    %c0_i32_1 = arith.constant 0 : i32
    return %c0_i32, %c0_i32_0 : i32, i32
  }
  func.func @transform_3(%arg0: i32, %arg1: i32) -> (i32, i32) {
    %c0_i32 = arith.constant 0 : i32
    %c0_i32_0 = arith.constant 0 : i32
    %c0_i32_1 = arith.constant 0 : i32
    return %c0_i32, %c0_i32_0 : i32, i32
  }
  func.func @transform_4(%arg0: i32, %arg1: i32) -> (i32, i32) {
    %c0_i32 = arith.constant 0 : i32
    %c0_i32_0 = arith.constant 0 : i32
    %c0_i32_1 = arith.constant 0 : i32
    return %c0_i32, %c0_i32_0 : i32, i32
  }
  func.func @transform_5(%arg0: i32, %arg1: i32) -> (i32, i32) {
    %c0_i32 = arith.constant 0 : i32
    %c0_i32_0 = arith.constant 0 : i32
    return %arg0, %c0_i32 : i32, i32
  }
}

</mosaic_0001>

<bundles_post_ra>
// kernel: _box_offset_intersection_impl.1
= control target key start
LH: loop header
LB: loop body
LE: loop exit
PB: predicated region body
PF: predicated region fallthrough
CT: control target
= control target key end

     0   :  { %v430_v2 = vmov 0.0   ;;  %vm431_vm0 = vmmov 0   ;;  %s621_s1 = inlined_call_operand.vmem [shape: f32[128,128], index: 1, kind: input, shape index: {}]   ;;  %s622_s0 = inlined_call_operand.vmem [shape: f32[8,8,128], index: 0, kind: input, shape index: {}]   ;;  %s623_s3 = inlined_call_operand.vmem [shape: f32[128,128], index: 3, kind: input, shape index: {}]   ;;  %s624_s2 = inlined_call_operand.vmem [shape: f32[1,128], index: 2, kind: input, shape index: {}]   ;;  %s625_s4 = inlined_call_operand.vmem [shape: f32[1,128], index: 4, kind: input, shape index: {}]   ;;  %s626_s5 = inlined_call_operand.vmem [shape: f32[8,128], index: 5, kind: output, shape index: {}]  }
   0x1   :  { %v49_v0 = vld [vmem:[%s621_s1 + $0x78] sm:$0xff]  ;;  %v48_v1 = vld [vmem:[%s621_s1 + $0x70] sm:$0xff]  ;;  %389 = vmatprep.subr.mxu1 %v430_v2  ;;  %v47_v3 = vld [vmem:[%s621_s1 + $0x68] sm:$0xff]  ;;  %421 = vmatprep.mubr.msk.f32.mxu1 %vm431_vm0, %v430_v2 }
   0x2   :  { %345 = vmatprep.subr.mxu0 %v49_v0  ;;  %v46_v4 = vld [vmem:[%s621_s1 + $0x60] sm:$0xff]  ;;  %v45_v5 = vld [vmem:[%s621_s1 + $0x58] sm:$0xff]  ;;  %v27_v9 = vld [vmem:[%s622_s0 + $0x8] sm:$0xff] }
   0x3   :  { %346 = vmatpush3.msra.mxu0 %v49_v0  ;;  %v26_v6 = vld [vmem:[%s622_s0] sm:$0xff]  ;;  %v28_v10 = vld [vmem:[%s622_s0 + $0x10] sm:$0xff]  ;;  %v29_v11 = vld [vmem:[%s622_s0 + $0x18] sm:$0xff] }
   0x4   :  { %347 = vmatprep.subr.mxu0 %v48_v1  ;;  %v484_v7 = vld [vmem:[%s622_s0 + $0x20] sm:$0xff]  ;;  %377 = vmatprep.mubr.f32.mxu0 %v26_v6  ;;  %v31_v12 = vld [vmem:[%s622_s0 + $0x28] sm:$0xff]  ;;  %v32_v13 = vld [vmem:[%s622_s0 + $0x30] sm:$0xff] }
   0x5   :  { %348 = vmatpush3.msra.mxu0 %v48_v1  ;;  %v181_v8 = vmin.f32 %v26_v6, %v484_v7  ;;  %v33_v14 = vld [vmem:[%s622_s0 + $0x38] sm:$0xff]  ;;  %v44_v15 = vld [vmem:[%s621_s1 + $0x50] sm:$0xff]  ;;  %v182_v16 = vmin.f32 %v27_v9, %v31_v12  ;;  %v183_v17 = vmin.f32 %v28_v10, %v32_v13  ;;  %v43_v21 = vld [vmem:[%s621_s1 + $0x48] sm:$0xff] }
   0x6   :  { %349 = vmatprep.subr.mxu0 %v47_v3  ;;  %v184_v18 = vmin.f32 %v29_v11, %v33_v14  ;;  %v210_v19 = vld [vmem:[%s623_s3 + $0x78] sm:$0xff]  ;;  %v209_v20 = vld [vmem:[%s623_s3 + $0x70] sm:$0xff]  ;;  %v208_v24 = vld [vmem:[%s623_s3 + $0x68] sm:$0xff] }
   0x7   :  { %350 = vmatpush3.msra.mxu0 %v47_v3  ;;  %390 = vmatpush3.msra.mxu1 %v210_v19  ;;  %v517_v22 = vmin.f32 %v181_v8, %v182_v16  ;;  %v42_v25 = vld [vmem:[%s621_s1 + $0x40] sm:$0xff]  ;;  %v41_v27 = vld [vmem:[%s621_s1 + $0x38] sm:$0xff]  ;;  %v40_v28 = vld [vmem:[%s621_s1 + $0x30] sm:$0xff] }
   0x8   :  { %351 = vmatprep.subr.mxu0 %v46_v4  ;;  %v519_v23 = vmin.f32 %v183_v17, %v184_v18  ;;  %391 = vmatprep.subr.mxu1 %v430_v2  ;;  %v39_v29 = vld [vmem:[%s621_s1 + $0x28] sm:$0xff]  ;;  %v38_v30 = vld [vmem:[%s621_s1 + $0x20] sm:$0xff]  ;;  %v37_v31 = vld [vmem:[%s621_s1 + $0x18] sm:$0xff] }
   0x9   :  { %352 = vmatpush3.msra.mxu0 %v46_v4  ;;  %392 = vmatpush3.msra.mxu1 %v209_v20  ;;  %v36_v32 = vld [vmem:[%s621_s1 + $0x10] sm:$0xff]  ;;  %v35_v33 = vld [vmem:[%s621_s1 + $0x8] sm:$0xff]  ;;  %v34_v34 = vld [vmem:[%s621_s1] sm:$0xff] }
   0xa   :  { %353 = vmatprep.subr.mxu0 %v45_v5  ;;  %v187_v26 = vmin.f32 %v517_v22, %v519_v23  ;;  %393 = vmatprep.subr.mxu1 %v430_v2  ;;  %v207_v35 = vld [vmem:[%s623_s3 + $0x60] sm:$0xff]  ;;  %v206_v36 = vld [vmem:[%s623_s3 + $0x58] sm:$0xff]  ;;  %v205_v37 = vld [vmem:[%s623_s3 + $0x50] sm:$0xff] }
   0xb   :  { %354 = vmatpush3.msra.mxu0 %v45_v5  ;;  %394 = vmatpush3.msra.mxu1 %v208_v24  ;;  %v204_v38 = vld [vmem:[%s623_s3 + $0x48] sm:$0xff]  ;;  %v203_v39 = vld [vmem:[%s623_s3 + $0x40] sm:$0xff]  ;;  %v202_v40 = vld [vmem:[%s623_s3 + $0x38] sm:$0xff] }
   0xc   :  { %355 = vmatprep.subr.mxu0 %v44_v15  ;;  %395 = vmatprep.subr.mxu1 %v430_v2  ;;  %v201_v41 = vld [vmem:[%s623_s3 + $0x30] sm:$0xff]  ;;  %v200_v42 = vld [vmem:[%s623_s3 + $0x28] sm:$0xff]  ;;  %v199_v43 = vld [vmem:[%s623_s3 + $0x20] sm:$0xff] }
   0xd   :  { %356 = vmatpush3.msra.mxu0 %v44_v15  ;;  %396 = vmatpush3.msra.mxu1 %v207_v35  ;;  %v198_v44 = vld [vmem:[%s623_s3 + $0x18] sm:$0xff]  ;;  %v197_v45 = vld [vmem:[%s623_s3 + $0x10] sm:$0xff]  ;;  %v196_v46 = vld [vmem:[%s623_s3 + $0x8] sm:$0xff] }
   0xe   :  { %357 = vmatprep.subr.mxu0 %v43_v21  ;;  %397 = vmatprep.subr.mxu1 %v430_v2  ;;  %v195_v47 = vld [vmem:[%s623_s3] sm:$0xff] }
   0xf   :  { %358 = vmatpush3.msra.mxu0 %v43_v21  ;;  %398 = vmatpush3.msra.mxu1 %v206_v36  ;;  %v301_v49 = vld [vmem:[%s624_s2] ss:$0 sm:$0xff] }
  0x10   :  { %359 = vmatprep.subr.mxu0 %v42_v25  ;;  %399 = vmatprep.subr.mxu1 %v430_v2  ;;  %v302_v17 = vld [vmem:[%s625_s4] ss:$0 sm:$0xff] }
  0x11   :  { %360 = vmatpush3.msra.mxu0 %v42_v25  ;;  %400 = vmatpush3.msra.mxu1 %v205_v37 }
  0x12   :  { %361 = vmatprep.subr.mxu0 %v41_v27  ;;  %401 = vmatprep.subr.mxu1 %v430_v2 }
  0x13   :  { %362 = vmatpush3.msra.mxu0 %v41_v27  ;;  %402 = vmatpush3.msra.mxu1 %v204_v38 }
  0x14   :  { %363 = vmatprep.subr.mxu0 %v40_v28  ;;  %403 = vmatprep.subr.mxu1 %v430_v2 }
  0x15   :  { %364 = vmatpush3.msra.mxu0 %v40_v28  ;;  %404 = vmatpush3.msra.mxu1 %v203_v39 }
  0x16   :  { %365 = vmatprep.subr.mxu0 %v39_v29  ;;  %405 = vmatprep.subr.mxu1 %v430_v2 }
  0x17   :  { %366 = vmatpush3.msra.mxu0 %v39_v29  ;;  %406 = vmatpush3.msra.mxu1 %v202_v40 }
  0x18   :  { %367 = vmatprep.subr.mxu0 %v38_v30  ;;  %407 = vmatprep.subr.mxu1 %v430_v2 }
  0x19   :  { %368 = vmatpush3.msra.mxu0 %v38_v30  ;;  %408 = vmatpush3.msra.mxu1 %v201_v41 }
  0x1a   :  { %369 = vmatprep.subr.mxu0 %v37_v31  ;;  %409 = vmatprep.subr.mxu1 %v430_v2 }
  0x1b   :  { %370 = vmatpush3.msra.mxu0 %v37_v31  ;;  %410 = vmatpush3.msra.mxu1 %v200_v42 }
  0x1c   :  { %371 = vmatprep.subr.mxu0 %v36_v32  ;;  %411 = vmatprep.subr.mxu1 %v430_v2 }
  0x1d   :  { %372 = vmatpush3.msra.mxu0 %v36_v32  ;;  %412 = vmatpush3.msra.mxu1 %v199_v43 }
  0x1e   :  { %373 = vmatprep.subr.mxu0 %v35_v33  ;;  %413 = vmatprep.subr.mxu1 %v430_v2 }
  0x1f   :  { %374 = vmatpush3.msra.mxu0 %v35_v33  ;;  %414 = vmatpush3.msra.mxu1 %v198_v44 }
  0x20   :  { %375 = vmatprep.subr.mxu0 %v34_v34  ;;  %415 = vmatprep.subr.mxu1 %v430_v2 }
  0x21   :  { %376 = vmatpush3.msra.mxu0 %v34_v34  ;;  %416 = vmatpush3.msra.mxu1 %v197_v45 }
  0x22   :  { %378 = vmatmul.mubr.f32.vlgmr.msra.gmra.mxu0 %v27_v9  ;;  %417 = vmatprep.subr.mxu1 %v430_v2 }
  0x23   :  { %380 = vmatprep.mubr.f32.mxu0 %v28_v10  ;;  %418 = vmatpush3.msra.mxu1 %v196_v46 }
  0x24   :  { %419 = vmatprep.subr.mxu1 %v430_v2 }
  0x25   :  { %420 = vmatpush3.msra.mxu1 %v195_v47 }
  0x26   :  { %381 = vmatmul.mubr.f32.gmra.mxu0 %v29_v11 }
  0x27   :  { %383 = vmatprep.mubr.f32.mxu0 %v484_v7 }
  0x2a   :  { %384 = vmatmul.mubr.f32.gmra.mxu0 %v31_v12 }
  0x2b   :  { %386 = vmatprep.mubr.f32.mxu0 %v32_v13 }
  0x2e   :  { %387 = vmatmul.mubr.f32.gmra.mxu0 %v33_v14 }
  0xe2   :  { %v379_v48 = vpop.f32.mrf.mxu0 }
  0xe3   :  { %v129_v51 = vadd.f32 %v379_v48, %v301_v49 }
  0xe4   :  { %v123_v50 = vpop.f32.mrf.mxu0 }
  0xe5   :  { %v124_v52 = vadd.f32 %v301_v49, %v123_v50  ;;  %v163_v56 = vmax.f32 %v129_v51, 0.0 }
  0xe6   :  { %v382_v53 = vpop.f32.mrf.mxu0 }
  0xe7   :  { %v162_v54 = vmax.f32 %v124_v52, 0.0  ;;  %v139_v57 = vadd.f32 %v382_v53, %v301_v49 }
  0xe8   :  { %v133_v55 = vpop.f32.mrf.mxu0 }
  0xe9   :  { %v134_v58 = vadd.f32 %v301_v49, %v133_v55  ;;  %v171_v60 = vadd.f32 %v163_v56, %v162_v54  ;;  %v165_v63 = vmax.f32 %v139_v57, 0.0 }
  0xea   :  { %v385_v59 = vpop.f32.mrf.mxu0 }
  0xeb   :  { %v164_v61 = vmax.f32 %v134_v58, 0.0  ;;  %v149_v1 = vadd.f32 %v385_v59, %v301_v49 }
  0xec   :  { %v143_v62 = vpop.f32.mrf.mxu0 }
  0xed   :  { %v172_v0 = vadd.f32 %v171_v60, %v164_v61  ;;  %v144_v2 = vadd.f32 %v301_v49, %v143_v62  ;;  %v167_v7 = vmax.f32 %v149_v1, 0.0 }
  0xee   :  { %v388_v3 = vpop.f32.mrf.mxu0 }
  0xef   :  { %v166_v4 = vmax.f32 %v144_v2, 0.0  ;;  %v173_v5 = vadd.f32 %v172_v0, %v165_v63  ;;  %v159_v9 = vadd.f32 %v388_v3, %v301_v49 }
  0xf0   :  { %v153_v6 = vpop.f32.mrf.mxu0 }
  0xf1   :  { %v174_v8 = vadd.f32 %v173_v5, %v166_v4  ;;  %v154_v10 = vadd.f32 %v301_v49, %v153_v6  ;;  %v169_v13 = vmax.f32 %v159_v9, 0.0 }
  0xf3   :  { %v168_v11 = vmax.f32 %v154_v10, 0.0  ;;  %v175_v12 = vadd.f32 %v174_v8, %v167_v7 }
  0xf5   :  { %v176_v14 = vadd.f32 %v175_v12, %v168_v11 }
  0xf7   :  { %v177_v15 = vadd.f32 %v176_v14, %v169_v13 }
  0xf9   :  { %v194_v16 = vmul.f32 0.125, %v177_v15 }
  0xfb   :  { %422 = vmatmul.mubr.f32.vlgmr.msra.gmra.mxu1 %v194_v16 }
 0x1bb   :  { %v284_v18 = vpop.f32.mrf.mxu1 }
 0x1bc   :  { %v285_v19 = vadd.f32 %v302_v17, %v284_v18 }
 0x1bd   :  { %v423_v20 = vpop.f32.mrf.mxu1 }
 0x1be   :  { %v303_v21 = vmul.f32 -1.442695, %v285_v19 }
 0x1c0   :  { %426 = vpow2.f32 %v303_v21 }
 0x1cd   :  { %v427_v24 = vpop.eup %426 }
 0x1ce   :  { %v291_v25 = vadd.f32 1.0, %v427_v24 }
 0x1d0   :  { %428 = vrcp.f32 %v291_v25 }
 0x1dd   :  { %v429_v27 = vpop.eup %428 }
 0x1de   :  { %v295_v28 = vmul.f32 %v429_v27, %v187_v26 }
 0x1e0   :  { %296 = vst [vmem:[%s626_s5] sm:$0xff] %v295_v28 }

</bundles_post_ra>
